<compile_context>
chip_gen: v6e
topology: v6e:2x2x1
jax: 0.10.0
libtpu: 0.0.40
codegen_flags: <defaults>
</compile_context>

<pallas_src>
import functools

import jax
import jax.numpy as jnp
from jax.experimental import pallas as pl
from jax.experimental.pallas import tpu as pltpu

LANE = 128
TB = 128  # batch rows per grid step


def _round_up(n, m):
    return ((n + m - 1) // m) * m


def mlp_kernel(x_ref, w1_ref, b1_ref, w2_ref, b2_ref, o_ref, *, d_out):
    # x_ref/w1_ref/w2_ref are bf16; biases and output are f32.
    h = jnp.dot(x_ref[...], w1_ref[...],
                preferred_element_type=jnp.float32) + b1_ref[...]
    h = jnp.maximum(h, 0.0)
    logits = jnp.dot(h.astype(jnp.bfloat16), w2_ref[...],
                     preferred_element_type=jnp.float32) + b2_ref[...]

    # Mask padded output columns so they contribute 0 to the softmax.
    col = jax.lax.broadcasted_iota(jnp.int32, logits.shape, 1)
    logits = jnp.where(col < d_out, logits, -1e30)

    # Numerically-stable row softmax (dim=1), f32 throughout.
    m = jnp.max(logits, axis=-1, keepdims=True)
    e = jnp.exp(logits - m)
    denom = jnp.sum(e, axis=-1, keepdims=True)
    o_ref[...] = (e * pl.reciprocal(denom, approx=True)).astype(o_ref.dtype)


def nn_forward(x, w1, b1, w2, b2):
    """x: [B, D_in] f32; w1: [D_in, H]; b1: [H]; w2: [H, D_out]; b2: [D_out]."""
    B, D_in = x.shape
    H = w1.shape[1]
    D_out = w2.shape[1]

    d_in_p = _round_up(D_in, LANE)
    h_p = _round_up(H, LANE)
    d_out_p = _round_up(D_out, LANE)

    def pad2d(a, rows, cols, dtype):
        out = jnp.zeros((rows, cols), dtype)
        return out.at[: a.shape[0], : a.shape[1]].set(a.astype(dtype))

    # Lane-dense, zero-padded operands; bf16 for MXU inputs, f32 for biases.
    x_p = pad2d(x, B, d_in_p, jnp.bfloat16)
    w1_p = pad2d(w1, d_in_p, h_p, jnp.bfloat16)
    b1_p = pad2d(b1.reshape(1, -1), 1, h_p, jnp.float32)
    w2_p = pad2d(w2, h_p, d_out_p, jnp.bfloat16)
    b2_p = pad2d(b2.reshape(1, -1), 1, d_out_p, jnp.float32)

    grid = (pl.cdiv(B, TB),)
    out_p = pl.pallas_call(
        functools.partial(mlp_kernel, d_out=D_out),
        out_shape=jax.ShapeDtypeStruct((B, d_out_p), jnp.float32),
        grid=grid,
        in_specs=[
            pl.BlockSpec((TB, d_in_p), lambda i: (i, 0)),   # x row block
            pl.BlockSpec((d_in_p, h_p), lambda i: (0, 0)),  # w1 pinned
            pl.BlockSpec((1, h_p), lambda i: (0, 0)),       # b1 pinned
            pl.BlockSpec((h_p, d_out_p), lambda i: (0, 0)), # w2 pinned
            pl.BlockSpec((1, d_out_p), lambda i: (0, 0)),   # b2 pinned
        ],
        out_specs=pl.BlockSpec((TB, d_out_p), lambda i: (i, 0)),
        compiler_params=pltpu.CompilerParams(
            dimension_semantics=("parallel",)),
    )(x_p, w1_p, b1_p, w2_p, b2_p)

    return out_p[:, :D_out]


def xavier_uniform(key, shape_out_in):
    # Matches nn.init.xavier_uniform_ bound: sqrt(6 / (fan_in + fan_out)).
    fan_out, fan_in = shape_out_in
    limit = (6.0 / (fan_in + fan_out)) ** 0.5
    return jax.random.uniform(key, shape_out_in, jnp.float32, -limit, limit)


if __name__ == "__main__":
    input_dim, hidden_dim, output_dim = 32, 5, 8
    batch = 256  # multiple of TB=128 -> grid of 2 parallel row blocks

    key = jax.random.PRNGKey(0)
    kx, k1, k2, kb1, kb2 = jax.random.split(key, 5)

    x = jax.random.normal(kx, (batch, input_dim), jnp.float32)

    # PyTorch Linear stores weight as [out, in]; xavier init, then transpose
    # to [in, out] for the kernel. Biases: small deterministic values.
    w1 = xavier_uniform(k1, (hidden_dim, input_dim)).T   # [D_in, H]
    w2 = xavier_uniform(k2, (output_dim, hidden_dim)).T  # [H, D_out]
    b1 = 0.1 * jax.random.normal(kb1, (hidden_dim,), jnp.float32)
    b2 = 0.1 * jax.random.normal(kb2, (output_dim,), jnp.float32)

    out = jax.block_until_ready(nn_forward(x, w1, b1, w2, b2))

    # Pure-JAX f32 reference (module semantics). bf16 MXU feeds give ~1e-3
    # level differences on the probabilities.
    ref_h = jnp.maximum(x @ w1 + b1[None, :], 0.0)
    ref = jax.nn.softmax(ref_h @ w2 + b2[None, :], axis=1)

    assert out.shape == (batch, output_dim)
    assert jnp.allclose(out, ref, atol=1e-2, rtol=1e-2)
    assert jnp.allclose(jnp.sum(out, axis=1), 1.0, atol=1e-2)

    print("KERNEL_OK")
</pallas_src>

<mosaic_0001>
module attributes {stable_mosaic.version = 11 : i64} {
  func.func @mlp_kernel(%arg0: i32, %arg1: memref<128x128xbf16, #tpu.memory_space<vmem>>, %arg2: memref<128x128xbf16, #tpu.memory_space<vmem>>, %arg3: memref<1x128xf32, #tpu.memory_space<vmem>>, %arg4: memref<128x128xbf16, #tpu.memory_space<vmem>>, %arg5: memref<1x128xf32, #tpu.memory_space<vmem>>, %arg6: memref<128x128xf32, #tpu.memory_space<vmem>>) attributes {dimension_semantics = [#tpu.dimension_semantics<parallel>], iteration_bounds = array<i64: 2>, scalar_prefetch = 0 : i64, scratch_operands = 0 : i64, tpu.core_type = #tpu.core_type<tc>, window_params = [{transform_indices = @transform_0, window_bounds = array<i64: 128, 128>}, {pipeline_mode = #tpu.pipeline_mode<synchronous>, transform_indices = @transform_1, window_bounds = array<i64: 128, 128>}, {pipeline_mode = #tpu.pipeline_mode<synchronous>, transform_indices = @transform_2, window_bounds = array<i64: 1, 128>}, {pipeline_mode = #tpu.pipeline_mode<synchronous>, transform_indices = @transform_3, window_bounds = array<i64: 128, 128>}, {pipeline_mode = #tpu.pipeline_mode<synchronous>, transform_indices = @transform_4, window_bounds = array<i64: 1, 128>}, {transform_indices = @transform_5, window_bounds = array<i64: 128, 128>}]} {
    %c0 = arith.constant 0 : index
    %c0_0 = arith.constant 0 : index
    %0 = vector.load %arg1[%c0, %c0_0] : memref<128x128xbf16, #tpu.memory_space<vmem>>, vector<128x128xbf16>
    %c0_1 = arith.constant 0 : index
    %c0_2 = arith.constant 0 : index
    %1 = vector.load %arg2[%c0_1, %c0_2] : memref<128x128xbf16, #tpu.memory_space<vmem>>, vector<128x128xbf16>
    %cst = arith.constant dense<0.000000e+00> : vector<128x128xf32>
    %2 = tpu.matmul %0, %1, %cst {dimension_numbers = #tpu.dot_dimension_numbers<[1], [0], [0], [1], [0, 0, 1, 1], [], []>} : vector<128x128xbf16>, vector<128x128xbf16>, vector<128x128xf32> -> vector<128x128xf32>
    %c0_3 = arith.constant 0 : index
    %c0_4 = arith.constant 0 : index
    %3 = vector.load %arg3[%c0_3, %c0_4] : memref<1x128xf32, #tpu.memory_space<vmem>>, vector<1x128xf32>
    %4 = vector.broadcast %3 : vector<1x128xf32> to vector<128x128xf32>
    %5 = arith.addf %2, %4 : vector<128x128xf32>
    %cst_5 = arith.constant 0.000000e+00 : f32
    %6 = vector.broadcast %cst_5 : f32 to vector<128x128xf32>
    %7 = arith.maximumf %5, %6 : vector<128x128xf32>
    %8 = arith.truncf %7 : vector<128x128xf32> to vector<128x128xbf16>
    %c0_6 = arith.constant 0 : index
    %c0_7 = arith.constant 0 : index
    %9 = vector.load %arg4[%c0_6, %c0_7] : memref<128x128xbf16, #tpu.memory_space<vmem>>, vector<128x128xbf16>
    %cst_8 = arith.constant dense<0.000000e+00> : vector<128x128xf32>
    %10 = tpu.matmul %8, %9, %cst_8 {dimension_numbers = #tpu.dot_dimension_numbers<[1], [0], [0], [1], [0, 0, 1, 1], [], []>} : vector<128x128xbf16>, vector<128x128xbf16>, vector<128x128xf32> -> vector<128x128xf32>
    %c0_9 = arith.constant 0 : index
    %c0_10 = arith.constant 0 : index
    %11 = vector.load %arg5[%c0_9, %c0_10] : memref<1x128xf32, #tpu.memory_space<vmem>>, vector<1x128xf32>
    %12 = vector.broadcast %11 : vector<1x128xf32> to vector<128x128xf32>
    %13 = arith.addf %10, %12 : vector<128x128xf32>
    %14 = tpu.iota {dimensions = array<i32: 1>} : vector<128x128xi32>
    %c8_i32 = arith.constant 8 : i32
    %15 = vector.broadcast %c8_i32 : i32 to vector<128x128xi32>
    %16 = arith.cmpi slt, %14, %15 : vector<128x128xi32>
    %cst_11 = arith.constant -1.000000e+30 : f32
    %17 = vector.broadcast %cst_11 : f32 to vector<128x128xf32>
    %18 = arith.select %16, %13, %17 : vector<128x128xi1>, vector<128x128xf32>
    %cst_12 = arith.constant dense<0xFF800000> : vector<128xf32>
    %19 = vector.multi_reduction <maximumf>, %18, %cst_12 [1] : vector<128x128xf32> to vector<128xf32>
    %20 = vector.shape_cast %19 : vector<128xf32> to vector<128x1xf32>
    %21 = vector.broadcast %20 : vector<128x1xf32> to vector<128x128xf32>
    %22 = arith.subf %18, %21 : vector<128x128xf32>
    %23 = math.exp %22 : vector<128x128xf32>
    %cst_13 = arith.constant dense<0.000000e+00> : vector<128xf32>
    %24 = vector.multi_reduction <add>, %23, %cst_13 [1] : vector<128x128xf32> to vector<128xf32>
    %25 = vector.shape_cast %24 : vector<128xf32> to vector<128x1xf32>
    %26 = tpu.reciprocal %25 {approx = true} : vector<128x1xf32> -> vector<128x1xf32>
    %27 = vector.broadcast %26 : vector<128x1xf32> to vector<128x128xf32>
    %28 = arith.mulf %23, %27 : vector<128x128xf32>
    %c0_14 = arith.constant 0 : index
    %c0_15 = arith.constant 0 : index
    %29 = vector.load %arg6[%c0_14, %c0_15] : memref<128x128xf32, #tpu.memory_space<vmem>>, vector<128x128xf32>
    tpu.vector_store %arg6[%c0_14, %c0_15], %28 {strides = array<i32>} : memref<128x128xf32, #tpu.memory_space<vmem>>, vector<128x128xf32>,
    return
  }
  func.func @transform_0(%arg0: i32) -> (i32, i32) {
    %c0_i32 = arith.constant 0 : i32
    %c0_i32_0 = arith.constant 0 : i32
    return %arg0, %c0_i32 : i32, i32
  }
  func.func @transform_1(%arg0: i32) -> (i32, i32) {
    %c0_i32 = arith.constant 0 : i32
    %c0_i32_0 = arith.constant 0 : i32
    %c0_i32_1 = arith.constant 0 : i32
    return %c0_i32, %c0_i32_0 : i32, i32
  }
  func.func @transform_2(%arg0: i32) -> (i32, i32) {
    %c0_i32 = arith.constant 0 : i32
    %c0_i32_0 = arith.constant 0 : i32
    %c0_i32_1 = arith.constant 0 : i32
    return %c0_i32, %c0_i32_0 : i32, i32
  }
  func.func @transform_3(%arg0: i32) -> (i32, i32) {
    %c0_i32 = arith.constant 0 : i32
    %c0_i32_0 = arith.constant 0 : i32
    %c0_i32_1 = arith.constant 0 : i32
    return %c0_i32, %c0_i32_0 : i32, i32
  }
  func.func @transform_4(%arg0: i32) -> (i32, i32) {
    %c0_i32 = arith.constant 0 : i32
    %c0_i32_0 = arith.constant 0 : i32
    %c0_i32_1 = arith.constant 0 : i32
    return %c0_i32, %c0_i32_0 : i32, i32
  }
  func.func @transform_5(%arg0: i32) -> (i32, i32) {
    %c0_i32 = arith.constant 0 : i32
    %c0_i32_0 = arith.constant 0 : i32
    return %arg0, %c0_i32 : i32, i32
  }
}

</mosaic_0001>

<bundles_post_ra>
// kernel: tpu_custom_call.1
= control target key start
LH: loop header
LB: loop body
LE: loop exit
PB: predicated region body
PF: predicated region fallthrough
CT: control target
= control target key end

     0   :  { %10 = vsyncpa [#allocation3], 0  ;;  %s1849_s0 = inlined_call_operand.hbm [shape: bf16[256,128], index: 0, kind: input, shape index: {}]   ;;  %s1850_s1 = inlined_call_operand.hbm [shape: bf16[128,128], index: 1, kind: input, shape index: {}]   ;;  %s1851_s2 = inlined_call_operand.vmem [shape: f32[1,128], index: 2, kind: input, shape index: {}]   ;;  %s1852_s3 = inlined_call_operand.hbm [shape: bf16[128,128], index: 3, kind: input, shape index: {}]   ;;  %s1853_s4 = inlined_call_operand.vmem [shape: f32[1,128], index: 4, kind: input, shape index: {}]   ;;  %s1854_s5 = inlined_call_operand.hbm [shape: f32[256,128], index: 5, kind: output, shape index: {}]  }
   0x1   :  { %12 = vsyncpa [#allocation3 + $0x1], 0 }
   0x2   :  { %13 = vsyncpa [#allocation6], 0 }
   0x3   :  { %14 = vsyncpa [#allocation4], 0 }
   0x4   :  { %16 = vsyncpa [#allocation4 + $0x1], 0  ;;  %s1473_s18 = smov 0   ;;  %s1475_s19 = smov 0  }
   0x5   :  { %s1477_s20 = smov 0   ;;  %s1479_s21 = smov 0  }
   0x6 LB: > { %s1494_s22 = sadd.s32 4294967295, %s1433_s21   ;;  %s984_s23 = sadd.s32 4294967294, %s1433_s21   ;;  %s1433_s21 = sphi %s1479_s21, %s1877_s21   ;;  %s1429_s20 = sphi %s1477_s20, %s1876_s20   ;;  %s1425_s19 = sphi %s1475_s19, %s1875_s19   ;;  %s1421_s18 = sphi %s1473_s18, %s1874_s18  }
   0x7   : > { %p42_p0 = scmp.ne.s32.totalorder %s1425_s19, %s1421_s18  ;;  %p1855_p1 = scmp.eq.s32.totalorder %s1494_s22, 0 }
   0x8   : > { %p150_p2 = scmp.eq.s32.totalorder %s1494_s22, 1  ;;  %p156_p3 = scmp.eq.s32.totalorder %s984_s23, 1 }
   0x9   : > { %p1503_p4 = por %p1855_p1, %p42_p0  ;;  %p985_p5 = scmp.ge.s32.totalorder %s1433_s21, 1 }
   0xa   : > { %p1508_p6 = por %p156_p3, %p42_p0  ;;  %p163_p7 = scmp.lt.s32.totalorder %s1433_s21, 3 }
   0xb   : > { %s1860_s24 = scalar_select %p1503_p4, 1, 0 }
   0xc   : > { %s1861_s25 = scalar_select %p1508_p6, 1, 0 }
   0xd   : > { %p1513_p8 = pnand %p985_p5, %p163_p7  ;;  %s1435_s27 = smov [#allocation5]  }
   0xe   : > { %s175_s28 = sshll.u32 %s1435_s27, 4  ;;  %s1436_s30 = smov [#allocation7]   ;;  %s176_s28 = int_to_ptr.vmem [resolvable:$true] %s175_s28 }
   0xf   : > { %s1862_s26 = scalar_select %p1513_p8, 1, 0 }
  0x10   : > { %p1138_p9 = pneg %p1513_p8  ;;  %s191_s6 = sshll.u32 %s1436_s30, 4  ;;  %s192_s6 = int_to_ptr.vmem [resolvable:$true] %s191_s6 }
  0x11   : > { %s1296_s7 = scalar_lea.vmem %s176_s28, 1024  ;;  %p1304_p5 = scmp.lt.s32.totalorder %s176_s28, %s176_s28 }
  0x12   : > { %p1522_p11 = pnand %p1138_p9, %p1855_p1  ;;  %p1297_p13 = scmp.ne.s32.totalorder %s176_s28, %s1296_s7 }
  0x13   : > { %p1305_p7 = scmp.lt.s32.totalorder %s1296_s7, %s1296_s7 }
  0x14   : > { %p1287_p12 = pneg %p1522_p11 }
  0x15   : > { %p1306_p10 = por %p1305_p7, %p1304_p5 }
  0x16   : > { %p1299_p0 = pnand %p1297_p13, %p1287_p12 }
  0x18   : > { %p1300_p3 = pneg %p1299_p0 }
  0x1a   : > { %p1307_p9 = pnand %p1306_p10, %p1300_p3 }
  0x1c   : > { %1310 = shalt.err (!%p1307_p9)
}
  0x1d   : > { %s1856_s8 = smov 64   ;;  %s1438_s9 = smov 4  }
  0x1e   : > { %1141 = dma.hbm_to_vmem [thread:$0]  (!%p1522_p11), %s1850_s1, 1024, %s176_s28, [#allocation6], %s1856_s8, %s1856_s8, %s1438_s9  }
  0x1f   : > { %s1322_s12 = scalar_lea.vmem %s192_s6, 1024  ;;  %p1330_p10 = scmp.lt.s32.totalorder %s192_s6, %s192_s6 }
  0x20   : > { %p1323_p13 = scmp.ne.s32.totalorder %s192_s6, %s1322_s12  ;;  %p1331_p3 = scmp.lt.s32.totalorder %s1322_s12, %s1322_s12 }
  0x22   : > { %p1325_p0 = pnand %p1323_p13, %p1287_p12  ;;  %p1332_p7 = por %p1331_p3, %p1330_p10 }
  0x24   : > { %p1326_p5 = pneg %p1325_p0 }
  0x26   : > { %p1333_p9 = pnand %p1332_p7, %p1326_p5 }
  0x28   : > { %1336 = shalt.err (!%p1333_p9)
}
  0x29   : > { %1144 = dma.hbm_to_vmem [thread:$0]  (!%p1522_p11), %s1852_s3, 1024, %s192_s6, [#allocation6], %s1856_s8, %s1856_s8, %s1438_s9  }
  0x2a   : > { %s1551_s15 = sadd.s32 1, %s1433_s21   ;;  %s29_s16 = sadd.s32 1, %s1429_s20 }
  0x2b   : > { %s26_s17 = ssub.s32 %s1433_s21, %s1551_s15  ;;  %p36_p12 = scmp.ne.s32.totalorder %s1429_s20, %s1425_s19 }
  0x2c   : > { %p27_p13 = scmp.eq.s32.totalorder %s26_s17, 0  ;;  %p37_p0 = scmp.eq.s32.totalorder %s1433_s21, 0 }
  0x2d   : > { %p1561_p5 = por %p150_p2, %p36_p12  ;;  %p1155_p10 = scmp.lt.s32.totalorder %s1433_s21, 2 }
  0x2e   : > { %s1567_s27 = scalar_select %p27_p13, %s1429_s20, %s29_s16  }
  0x2f   : > { %s1864_s23 = scalar_select %p1561_p5, 1, 0 }
  0x30   : > { %p38_p3 = por %p37_p0, %p36_p12  ;;  %s208_s28 = sand.u32 1, %s1429_s20  }
  0x31   : > { %s989_s29 = sshll.u32 %s208_s28, 6  ;;  %s1028_s30 = sshll.u32 %s1433_s21, 10 }
  0x32   : > { %s1574_s10 = scalar_lea.hbm %s1849_s0, %s1028_s30  ;;  %s212_s11 = scalar_lea.vmem [#allocation2], %s989_s29 }
  0x33   : > { %s219_s12 = sshll.u32 %s212_s11, 4  ;;  %p1578_p2 = pnand %p1155_p10, %p38_p3  ;;  %s1576_s12 = int_to_ptr.vmem [resolvable:$true] %s219_s12 }
  0x34   : > { %s1582_s14 = scalar_lea.sflag [#allocation3], %s208_s28  ;;  %s1337_s16 = scalar_lea.hbm %s1574_s10, 1024 }
  0x35   : > { %p1338_p11 = scmp.ne.s32.totalorder %s1574_s10, %s1337_s16  ;;  %p1339_p7 = pneg %p1578_p2 }
  0x36   : > { %s1342_s29 = scalar_lea.hbm %s1849_s0, 2048  ;;  %p1343_p13 = scmp.lt.s32.totalorder %s1574_s10, %s1849_s0 }
  0x37   : > { %p1340_p9 = pnand %p1339_p7, %p1338_p11  ;;  %p1344_p0 = scmp.lt.s32.totalorder %s1342_s29, %s1337_s16 }
  0x39   : > { %p1341_p12 = pneg %p1340_p9  ;;  %p1345_p10 = por %p1344_p0, %p1343_p13 }
  0x3b   : > { %p1346_p3 = pnand %p1345_p10, %p1341_p12 }
  0x3d   : > { %1349 = shalt.err (!%p1346_p3)
}
  0x3e   : > { %s1350_s28 = scalar_lea.vmem %s1576_s12, 1024  ;;  %s1439_s11 = smov [#allocation2]  }
  0x3f   : > { %p1351_p1 = scmp.ne.s32.totalorder %s1576_s12, %s1350_s28  ;;  %s1355_s8 = sshll.u32 %s1439_s11, 4  ;;  %s1356_s8 = int_to_ptr.vmem [resolvable:$false] %s1355_s8 }
  0x40   : > { %s1357_s17 = scalar_lea.vmem %s1356_s8, 2048  ;;  %p1358_p9 = scmp.lt.s32.totalorder %s1576_s12, %s1356_s8 }
  0x41   : > { %p1353_p6 = pnand %p1351_p1, %p1339_p7  ;;  %p1359_p5 = scmp.lt.s32.totalorder %s1357_s17, %s1350_s28 }
  0x43   : > { %p1354_p11 = pneg %p1353_p6  ;;  %p1360_p4 = por %p1359_p5, %p1358_p9 }
  0x45   : > { %p1361_p8 = pnand %p1360_p4, %p1354_p11 }
  0x47   : > { %1364 = shalt.err (!%p1361_p8)
}
  0x48   : > { %s1866_s16 = smov 64   ;;  %p1867_p1 = scmp.ne.s32.totalorder %s1862_s26, 0 }
  0x49   : > { %1148 = dma.hbm_to_vmem [thread:$0]  (!%p1578_p2), %s1574_s10, 1024, %s1576_s12, %s1582_s14, %s1866_s16, %s1866_s16, %s1438_s9  }
  0x4a   : > { %231 = sbr.rel (%p1867_p1) target bundleno = 876 (0x36c), region = 40  ;;  %s1609_s30 = sand.u32 (!%p1867_p1), 1, %s1425_s19  }
  0x4b   : > { %s993_s8 = sshll.u32 (!%p1867_p1), %s1609_s30, 6  ;;  %s234_s29 = scalar_lea.sflag (!%p1867_p1), [#allocation3], %s1609_s30 }
  0x4c   : > { %s1613_s6 = scalar_lea.vmem (!%p1867_p1), [#allocation2], %s993_s8  ;;  %p1868_p4 = scmp.ne.s32.totalorder (!%p1867_p1), %s1860_s24, 0 }
  0x4f   : > { %1408 = dma.done.wait (%p1868_p4), %s234_s29, 1024  }
  0x50   : > { %1410 = vsyncadd (%p1868_p4), %s234_s29, 4294966272  ;;  %p1869_p6 = scmp.eq.s32.totalorder %s1494_s22, 0 }
  0x52   : > { %1412 = dma.done.wait (%p1869_p6), [#allocation6], 2048   ;;  %p1870_p8 = pmov %p1869_p6 }
  0x53   : > { %v1197_v0 = vld [vmem:[#allocation5 + $0x38] sm:$0xff]   ;;  %v1198_v1 = vld [vmem:[#allocation5 + $0x30] sm:$0xff]   ;;  %v1199_v2 = vld [vmem:[#allocation5 + $0x28] sm:$0xff]   ;;  %s996_s12 = sshll.u32 %s1609_s30, 7  ;;  %s1029_s14 = sshll.u32 %s1494_s22, 11 }
  0x54   : > { %1414 = vsyncadd (%p1870_p8), [#allocation6], 4294965248  ;;  %1062 = vmatprep.subr.bf16.mxu0 %v1197_v0  ;;  %v1200_v3 = vld [vmem:[#allocation5 + $0x20] sm:$0xff]   ;;  %v1201_v5 = vld [vmem:[#allocation5 + $0x18] sm:$0xff]   ;;  %s1766_s13 = scalar_lea.vmem [#allocation8], %s996_s12  ;;  %s1802_s17 = scalar_lea.hbm %s1854_s5, %s1029_s14 }
  0x55   : > { %1063 = vmatpush3.bf16.msra.mxu0 %v1197_v0  ;;  %v1205_v4 = vld [vmem:[%s1613_s6] sm:$0xff]   ;;  %v1202_v6 = vld [vmem:[#allocation5 + $0x10] sm:$0xff]   ;;  %v1213_v7 = vld [vmem:[#allocation7 + $0x38] sm:$0xff]   ;;  %s892_s7 = sshll.u32 %s1766_s13, 4  ;;  %s879_s22 = scalar_lea.sflag [#allocation4], %s1609_s30  ;;  %s1804_s7 = int_to_ptr.vmem [resolvable:$true] %s892_s7 }
  0x56   : > { %1064 = vmatprep.subr.bf16.mxu0 %v1198_v1  ;;  %1078 = vmatprep.mubr.bf16.mxu0 %v1205_v4  ;;  %v1214_v8 = vld [vmem:[#allocation7 + $0x30] sm:$0xff]   ;;  %v1203_v9 = vld [vmem:[#allocation5 + $0x8] sm:$0xff]   ;;  %v1204_v11 = vld [vmem:[#allocation5] sm:$0xff]   ;;  %s1365_s16 = scalar_lea.vmem %s1804_s7, 2048  ;;  %p1871_p2 = scmp.ne.s32.totalorder %s1864_s23, 0 }
  0x57   : > { %1094 = vmatprep.subr.bf16.mxu1 %v1213_v7  ;;  %v1215_v10 = vld [vmem:[#allocation7 + $0x28] sm:$0xff]   ;;  %v1216_v12 = vld [vmem:[#allocation7 + $0x20] sm:$0xff]   ;;  %v1217_v13 = vld [vmem:[#allocation7 + $0x18] sm:$0xff]   ;;  %p1366_p5 = scmp.ne.s32.totalorder %s1804_s7, %s1365_s16  ;;  %s1440_s8 = smov [#allocation8]  }
  0x58   : > { %1095 = vmatpush3.bf16.msra.mxu1 %v1213_v7  ;;  %v1206_v14 = vld [vmem:[%s1613_s6 + $0x8] sm:$0xff]   ;;  %v1207_v15 = vld [vmem:[%s1613_s6 + $0x10] sm:$0xff]   ;;  %v1208_v16 = vld [vmem:[%s1613_s6 + $0x18] sm:$0xff]   ;;  %s1369_s29 = sshll.u32 %s1440_s8, 4  ;;  %s1370_s29 = int_to_ptr.vmem [resolvable:$false] %s1369_s29 }
  0x59   : > { %1065 = vmatpush3.bf16.msra.mxu0 %v1198_v1  ;;  %1096 = vmatprep.subr.bf16.mxu1 %v1214_v8  ;;  %v1209_v17 = vld [vmem:[%s1613_s6 + $0x20] sm:$0xff]   ;;  %v1210_v18 = vld [vmem:[%s1613_s6 + $0x28] sm:$0xff]   ;;  %v1211_v19 = vld [vmem:[%s1613_s6 + $0x30] sm:$0xff]   ;;  %p1367_p7 = pnand %p1366_p5, %p1871_p2  ;;  %p1372_p13 = scmp.lt.s32.totalorder %s1804_s7, %s1370_s29 }
  0x5a   : > { %1066 = vmatprep.subr.bf16.mxu0 %v1199_v2  ;;  %v1212_v20 = vld [vmem:[%s1613_s6 + $0x38] sm:$0xff]   ;;  %v1218_v21 = vld [vmem:[#allocation7 + $0x10] sm:$0xff]   ;;  %v1219_v22 = vld [vmem:[#allocation7 + $0x8] sm:$0xff]   ;;  %s1371_s6 = scalar_lea.vmem %s1370_s29, 4096 }
  0x5b   : > { %v1220_v23 = vld [vmem:[#allocation7] sm:$0xff]   ;;  %p1368_p12 = pneg %p1367_p7  ;;  %p1373_p0 = scmp.lt.s32.totalorder %s1371_s6, %s1365_s16 }
  0x5c   : > { %1097 = vmatpush3.bf16.msra.mxu1 %v1214_v8  ;;  %v997_v26 = vld [vmem:[%s1851_s2] ss:$0 sm:$0xff] }
  0x5d   : > { %1067 = vmatpush3.bf16.msra.mxu0 %v1199_v2  ;;  %1098 = vmatprep.subr.bf16.mxu1 %v1215_v10  ;;  %p1374_p10 = por %p1373_p0, %p1372_p13 }
  0x5e   : > { %1068 = vmatprep.subr.bf16.mxu0 %v1200_v3 }
  0x5f   : > { %p1375_p3 = pnand %p1374_p10, %p1368_p12 }
  0x60   : > { %1099 = vmatpush3.bf16.msra.mxu1 %v1215_v10 }
  0x61   : > { %1069 = vmatpush3.bf16.msra.mxu0 %v1200_v3  ;;  %1100 = vmatprep.subr.bf16.mxu1 %v1216_v12 }
  0x62   : > { %1070 = vmatprep.subr.bf16.mxu0 %v1201_v5 }
  0x64   : > { %1101 = vmatpush3.bf16.msra.mxu1 %v1216_v12 }
  0x65   : > { %1071 = vmatpush3.bf16.msra.mxu0 %v1201_v5  ;;  %1102 = vmatprep.subr.bf16.mxu1 %v1217_v13 }
  0x66   : > { %1072 = vmatprep.subr.bf16.mxu0 %v1202_v6 }
  0x68   : > { %1103 = vmatpush3.bf16.msra.mxu1 %v1217_v13 }
  0x69   : > { %1073 = vmatpush3.bf16.msra.mxu0 %v1202_v6  ;;  %1104 = vmatprep.subr.bf16.mxu1 %v1218_v21 }
  0x6a   : > { %1074 = vmatprep.subr.bf16.mxu0 %v1203_v9 }
  0x6c   : > { %1105 = vmatpush3.bf16.msra.mxu1 %v1218_v21 }
  0x6d   : > { %1075 = vmatpush3.bf16.msra.mxu0 %v1203_v9  ;;  %1106 = vmatprep.subr.bf16.mxu1 %v1219_v22 }
  0x6e   : > { %1076 = vmatprep.subr.bf16.mxu0 %v1204_v11 }
  0x70   : > { %1107 = vmatpush3.bf16.msra.mxu1 %v1219_v22 }
  0x71   : > { %1077 = vmatpush3.bf16.msra.mxu0 %v1204_v11  ;;  %1108 = vmatprep.subr.bf16.mxu1 %v1220_v23 }
  0x74   : > { %1079 = vmatmul.mubr.bf16.vlgmr.msra.gmra.mxu0 %v1206_v14  ;;  %1109 = vmatpush3.bf16.msra.mxu1 %v1220_v23 }
  0x75   : > { %1082 = vmatprep.mubr.bf16.mxu0 %v1207_v15 }
  0x7c   : > { %1083 = vmatmul.mubr.bf16.gmra.mxu0 %v1208_v16 }
  0x7d   : > { %1086 = vmatprep.mubr.bf16.mxu0 %v1209_v17  ;;  %v699_v17 = vlaneseq }
  0x84   : > { %1087 = vmatmul.mubr.bf16.gmra.mxu0 %v1210_v18  ;;  %v1634_v18 = vand.u32 127, %v699_v17 }
  0x85   : > { %1090 = vmatprep.mubr.bf16.mxu0 %v1211_v19  ;;  %v1014_v19 = vld [vmem:[%s1853_s4] ss:$0 sm:$0xff] }
  0x86   : > { %vm701_vm0 = vcmp.lt.s32.totalorder %v1634_v18, 8 }
  0x8c   : > { %1091 = vmatmul.mubr.bf16.gmra.mxu0 %v1212_v20 }
 0x134   : > { %v1080_v24 = vpop.f32.mrf.mxu0 }
 0x135   : > { %v453_v30 = vadd.f32 %v1080_v24, %v997_v26 }
 0x136   : > { %v444_v25 = vpop.f32.mrf.mxu0 }
 0x137   : > { %v445_v28 = vadd.f32 %v997_v26, %v444_v25  ;;  %v509_v37 = vmax.f32 %v453_v30, 0.0 }
 0x138   : > { %v1081_v27 = vpop.f32.mrf.mxu0 }
 0x139   : > { %v456_v29 = vadd.f32 %v1081_v27, %v997_v26  ;;  %v507_v35 = vmax.f32 %v445_v28, 0.0 }
 0x13a   : > { %v447_v31 = vpop.f32.mrf.mxu0 }
 0x13b   : > { %v448_v32 = vadd.f32 %v997_v26, %v447_v31  ;;  %v510_v33 = vmax.f32 %v456_v29, 0.0 }
 0x13c   : > { %v1084_v34 = vpop.f32.mrf.mxu0 }
 0x13d   : > { %v508_v36 = vmax.f32 %v448_v32, 0.0  ;;  %v524_v40 = vpack.c.bf16 %v510_v33, %v509_v37  ;;  %v469_v44 = vadd.f32 %v1084_v34, %v997_v26 }
 0x13e   : > { %v460_v38 = vpop.f32.mrf.mxu0 }
 0x13f   : > { %v523_v39 = vpack.c.bf16 %v508_v36, %v507_v35  ;;  %v461_v42 = vadd.f32 %v997_v26, %v460_v38  ;;  %v513_v51 = vmax.f32 %v469_v44, 0.0 }
 0x140   : > { %v1085_v41 = vpop.f32.mrf.mxu0 }
 0x141   : > { %v472_v43 = vadd.f32 %v1085_v41, %v997_v26  ;;  %1110 = vmatprep.mubr.bf16.mxu1 %v523_v39  ;;  %v511_v49 = vmax.f32 %v461_v42, 0.0 }
 0x142   : > { %v463_v45 = vpop.f32.mrf.mxu0  ;;  %1111 = vmatmul.mubr.bf16.vlgmr.msra.gmra.mxu1 %v524_v40 }
 0x143   : > { %v464_v46 = vadd.f32 %v997_v26, %v463_v45  ;;  %v514_v47 = vmax.f32 %v472_v43, 0.0 }
 0x144   : > { %v1088_v48 = vpop.f32.mrf.mxu0 }
 0x145   : > { %v512_v50 = vmax.f32 %v464_v46, 0.0  ;;  %v526_v54 = vpack.c.bf16 %v514_v47, %v513_v51  ;;  %v485_v58 = vadd.f32 %v1088_v48, %v997_v26 }
 0x146   : > { %v476_v52 = vpop.f32.mrf.mxu0 }
 0x147   : > { %v525_v53 = vpack.c.bf16 %v512_v50, %v511_v49  ;;  %v477_v56 = vadd.f32 %v997_v26, %v476_v52  ;;  %v517_v1 = vmax.f32 %v485_v58, 0.0 }
 0x148   : > { %v1089_v55 = vpop.f32.mrf.mxu0 }
 0x149   : > { %v488_v57 = vadd.f32 %v1089_v55, %v997_v26  ;;  %1114 = vmatprep.mubr.bf16.mxu1 %v525_v53  ;;  %v515_v63 = vmax.f32 %v477_v56, 0.0 }
 0x14a   : > { %v479_v59 = vpop.f32.mrf.mxu0  ;;  %1115 = vmatmul.mubr.bf16.gmra.mxu1 %v526_v54 }
 0x14b   : > { %v480_v60 = vadd.f32 %v997_v26, %v479_v59  ;;  %v518_v61 = vmax.f32 %v488_v57, 0.0 }
 0x14c   : > { %v1092_v62 = vpop.f32.mrf.mxu0 }
 0x14d   : > { %v516_v0 = vmax.f32 %v480_v60, 0.0  ;;  %v528_v4 = vpack.c.bf16 %v518_v61, %v517_v1  ;;  %v501_v8 = vadd.f32 %v1092_v62, %v997_v26 }
 0x14e   : > { %v492_v2 = vpop.f32.mrf.mxu0 }
 0x14f   : > { %v527_v3 = vpack.c.bf16 %v516_v0, %v515_v63  ;;  %v493_v6 = vadd.f32 %v997_v26, %v492_v2  ;;  %v521_v14 = vmax.f32 %v501_v8, 0.0 }
 0x150   : > { %v1093_v5 = vpop.f32.mrf.mxu0 }
 0x151   : > { %v504_v7 = vadd.f32 %v1093_v5, %v997_v26  ;;  %1118 = vmatprep.mubr.bf16.mxu1 %v527_v3  ;;  %v519_v12 = vmax.f32 %v493_v6, 0.0 }
 0x152   : > { %v495_v9 = vpop.f32.mrf.mxu0  ;;  %1119 = vmatmul.mubr.bf16.gmra.mxu1 %v528_v4 }
 0x153   : > { %v496_v10 = vadd.f32 %v997_v26, %v495_v9  ;;  %v522_v11 = vmax.f32 %v504_v7, 0.0 }
 0x155   : > { %v520_v13 = vmax.f32 %v496_v10, 0.0  ;;  %v530_v16 = vpack.c.bf16 %v522_v11, %v521_v14 }
 0x157   : > { %v529_v15 = vpack.c.bf16 %v520_v13, %v519_v12 }
 0x159   : > { %1122 = vmatprep.mubr.bf16.mxu1 %v529_v15 }
 0x15a   : > { %1123 = vmatmul.mubr.bf16.gmra.mxu1 %v530_v16 }
 0x202   : > { %v1112_v20 = vpop.f32.mrf.mxu1 }
 0x203   : > { %v645_v21 = vadd.f32 %v1112_v20, %v1014_v19 }
 0x204   : > { %v636_v22 = vpop.f32.mrf.mxu1 }
 0x205   : > { %v637_v23 = vadd.f32 %v1014_v19, %v636_v22  ;;  %v1642_v24 = vsel %vm701_vm0, %v645_v21, -1e+30 }
 0x206   : > { %722 = vmax.xlane.f32.xlu1 %v1642_v24  ;;  %v1113_v25 = vpop.f32.mrf.mxu1 }
 0x207   : > { %v648_v26 = vadd.f32 %v1113_v25, %v1014_v19  ;;  %v1647_v27 = vsel %vm701_vm0, %v637_v23, -1e+30 }
 0x208   : > { %v639_v28 = vpop.f32.mrf.mxu1  ;;  %718 = vmax.xlane.f32.xlu0 %v1647_v27 }
 0x209   : > { %v640_v29 = vadd.f32 %v1014_v19, %v639_v28  ;;  %v705_v30 = vsel %vm701_vm0, %v648_v26, -1e+30 }
 0x20a   : > { %724 = vmax.xlane.f32.xlu1 %v705_v30  ;;  %v1116_v31 = vpop.f32.mrf.mxu1 }
 0x20b   : > { %v661_v32 = vadd.f32 %v1116_v31, %v1014_v19  ;;  %v703_v33 = vsel %vm701_vm0, %v640_v29, -1e+30 }
 0x20c   : > { %v652_v34 = vpop.f32.mrf.mxu1  ;;  %720 = vmax.xlane.f32.xlu0 %v703_v33 }
 0x20d   : > { %v653_v36 = vadd.f32 %v1014_v19, %v652_v34  ;;  %v708_v38 = vsel %vm701_vm0, %v661_v32, -1e+30 }
 0x20e   : > { %v1117_v35 = vpop.f32.mrf.mxu1 }
 0x20f   : > { %v664_v37 = vadd.f32 %v1117_v35, %v1014_v19  ;;  %v706_v44 = vsel %vm701_vm0, %v653_v36, -1e+30 }
 0x210   : > { %v655_v39 = vpop.f32.mrf.mxu1  ;;  %730 = vmax.xlane.f32.xlu0 %v708_v38 }
 0x211   : > { %v656_v40 = vadd.f32 %v1014_v19, %v655_v39  ;;  %v709_v41 = vsel %vm701_vm0, %v664_v37, -1e+30 }
 0x212   : > { %732 = vmax.xlane.f32.xlu1 %v709_v41  ;;  %v1120_v42 = vpop.f32.mrf.mxu1 }
 0x213   : > { %v677_v43 = vadd.f32 %v1120_v42, %v1014_v19  ;;  %v1662_v46 = vsel %vm701_vm0, %v656_v40, -1e+30 }
 0x214   : > { %v668_v45 = vpop.f32.mrf.mxu1  ;;  %726 = vmax.xlane.f32.xlu0 %v706_v44 }
 0x215   : > { %v669_v48 = vadd.f32 %v1014_v19, %v668_v45  ;;  %v1667_v50 = vsel %vm701_vm0, %v677_v43, -1e+30 }
 0x216   : > { %v1121_v47 = vpop.f32.mrf.mxu1  ;;  %728 = vmax.xlane.f32.xlu1 %v1662_v46 }
 0x217   : > { %v680_v49 = vadd.f32 %v1121_v47, %v1014_v19  ;;  %v1677_v55 = vsel %vm701_vm0, %v669_v48, -1e+30 }
 0x218   : > { %v671_v51 = vpop.f32.mrf.mxu1  ;;  %738 = vmax.xlane.f32.xlu0 %v1667_v50 }
 0x219   : > { %v672_v52 = vadd.f32 %v1014_v19, %v671_v51  ;;  %v1672_v53 = vsel %vm701_vm0, %v680_v49, -1e+30 }
 0x21a   : > { %v1124_v54 = vpop.f32.mrf.mxu1  ;;  %740 = vmax.xlane.f32.xlu1 %v1672_v53 }
 0x21b   : > { %v1682_v58 = vsel %vm701_vm0, %v672_v52, -1e+30  ;;  %v693_v60 = vadd.f32 %v1124_v54, %v1014_v19 }
 0x21c   : > { %v684_v56 = vpop.f32.mrf.mxu1  ;;  %734 = vmax.xlane.f32.xlu0 %v1677_v55 }
 0x21d   : > { %v685_v57 = vadd.f32 %v1014_v19, %v684_v56  ;;  %v1696_v2 = vsel %vm701_vm0, %v693_v60, -1e+30 }
 0x21e   : > { %v1125_v59 = vpop.f32.mrf.mxu1  ;;  %736 = vmax.xlane.f32.xlu1 %v1682_v58 }
 0x21f   : > { %v1687_v61 = vsel %vm701_vm0, %v685_v57, -1e+30  ;;  %v696_v0 = vadd.f32 %v1125_v59, %v1014_v19 }
 0x220   : > { %v687_v62 = vpop.f32.mrf.mxu1  ;;  %742 = vmax.xlane.f32.xlu0 %v1687_v61 }
 0x221   : > { %v688_v63 = vadd.f32 %v1014_v19, %v687_v62  ;;  %v1702_v3 = vsel %vm701_vm0, %v696_v0, -1e+30 }
 0x223   : > { %v1692_v1 = vsel %vm701_vm0, %v688_v63, -1e+30 }
 0x224   : > { %744 = vmax.xlane.f32.xlu1 %v1692_v1  ;;  %746 = vmax.xlane.f32.xlu0 %v1696_v2 }
 0x228   : > { %748 = vmax.xlane.f32.xlu1 %v1702_v3 }
 0x28f   : > { %v723_v4 = vpop.xlane.xlu1 %722 }
 0x290   : > { %v752_v5 = vsub.f32 %v1642_v24, %v723_v4 }
 0x291   : > { %v719_v6 = vpop.xlane.xlu0 %718 }
 0x292   : > { %v770_v7 = vmul.f32 1.442695, %v752_v5  ;;  %v750_v8 = vsub.f32 %v1647_v27, %v719_v6 }
 0x293   : > { %v725_v9 = vpop.xlane.xlu1 %724 }
 0x294   : > { %1221 = vpow2.f32 %v770_v7  ;;  %v766_v10 = vmul.f32 1.442695, %v750_v8  ;;  %v753_v11 = vsub.f32 %v705_v30, %v725_v9 }
 0x295   : > { %v721_v12 = vpop.xlane.xlu0 %720 }
 0x296   : > { %v772_v13 = vmul.f32 1.442695, %v753_v11  ;;  %v751_v14 = vsub.f32 %v703_v33, %v721_v12  ;;  %1223 = vpow2.f32 %v766_v10 }
 0x298   : > { %1225 = vpow2.f32 %v772_v13  ;;  %v768_v15 = vmul.f32 1.442695, %v751_v14 }
 0x299   : > { %v731_v16 = vpop.xlane.xlu0 %730 }
 0x29a   : > { %v756_v17 = vsub.f32 %v708_v38, %v731_v16  ;;  %1227 = vpow2.f32 %v768_v15 }
 0x29b   : > { %v733_v18 = vpop.xlane.xlu1 %732 }
 0x29c   : > { %v778_v19 = vmul.f32 1.442695, %v756_v17  ;;  %v757_v20 = vsub.f32 %v709_v41, %v733_v18 }
 0x29d   : > { %v727_v21 = vpop.xlane.xlu0 %726 }
 0x29e   : > { %1229 = vpow2.f32 %v778_v19  ;;  %v780_v22 = vmul.f32 1.442695, %v757_v20  ;;  %v754_v23 = vsub.f32 %v706_v44, %v727_v21 }
 0x29f   : > { %v729_v24 = vpop.xlane.xlu1 %728 }
 0x2a0   : > { %1231 = vpow2.f32 %v780_v22  ;;  %v774_v25 = vmul.f32 1.442695, %v754_v23  ;;  %v755_v26 = vsub.f32 %v1662_v46, %v729_v24 }
 0x2a1   : > { %v1708_v27 = vpop.eup %1221  ;;  %v739_v28 = vpop.xlane.xlu0 %738 }
 0x2a2   : > { %1233 = vpow2.f32 %v774_v25  ;;  %v776_v29 = vmul.f32 1.442695, %v755_v26  ;;  %v760_v30 = vsub.f32 %v1667_v50, %v739_v28  ;;  %802 = vadd.xlane.f32.xlu0 %v1708_v27 }
 0x2a3   : > { %v741_v31 = vpop.xlane.xlu1 %740  ;;  %v1712_v32 = vpop.eup %1223 }
 0x2a4   : > { %1235 = vpow2.f32 %v776_v29  ;;  %v786_v33 = vmul.f32 1.442695, %v760_v30  ;;  %v761_v34 = vsub.f32 %v1672_v53, %v741_v31 }
 0x2a5   : > { %v1715_v35 = vpop.eup %1225  ;;  %v735_v36 = vpop.xlane.xlu0 %734 }
 0x2a6   : > { %1237 = vpow2.f32 %v786_v33  ;;  %v788_v37 = vmul.f32 1.442695, %v761_v34  ;;  %v758_v38 = vsub.f32 %v1677_v55, %v735_v36  ;;  %804 = vadd.xlane.f32.xlu1 %v1715_v35  ;;  %798 = vadd.xlane.f32.xlu0 %v1712_v32 }
 0x2a7   : > { %v737_v39 = vpop.xlane.xlu1 %736  ;;  %v1721_v42 = vpop.eup %1227 }
 0x2a8   : > { %1239 = vpow2.f32 %v788_v37  ;;  %v782_v40 = vmul.f32 1.442695, %v758_v38  ;;  %v759_v41 = vsub.f32 %v1682_v58, %v737_v39 }
 0x2a9   : > { %v743_v43 = vpop.xlane.xlu0 %742 }
 0x2aa   : > { %1241 = vpow2.f32 %v782_v40  ;;  %v784_v44 = vmul.f32 1.442695, %v759_v41  ;;  %v762_v45 = vsub.f32 %v1687_v61, %v743_v43  ;;  %800 = vadd.xlane.f32.xlu1 %v1721_v42 }
 0x2ab   : > { %v1725_v46 = vpop.eup %1229 }
 0x2ac   : > { %1243 = vpow2.f32 %v784_v44  ;;  %v790_v47 = vmul.f32 1.442695, %v762_v45  ;;  %810 = vadd.xlane.f32.xlu0 %v1725_v46 }
 0x2ad   : > { %v1728_v48 = vpop.eup %1231  ;;  %v745_v49 = vpop.xlane.xlu1 %744 }
 0x2ae   : > { %v747_v50 = vpop.xlane.xlu0 %746  ;;  %1245 = vpow2.f32 %v790_v47  ;;  %v763_v51 = vsub.f32 %v1692_v1, %v745_v49  ;;  %812 = vadd.xlane.f32.xlu1 %v1728_v48 }
 0x2af   : > { %v764_v52 = vsub.f32 %v1696_v2, %v747_v50  ;;  %v1733_v53 = vpop.eup %1233 }
 0x2b0   : > { %v792_v54 = vmul.f32 1.442695, %v763_v51  ;;  %806 = vadd.xlane.f32.xlu0 %v1733_v53 }
 0x2b1   : > { %v794_v55 = vmul.f32 1.442695, %v764_v52  ;;  %v1736_v56 = vpop.eup %1235  ;;  %v749_v57 = vpop.xlane.xlu1 %748 }
 0x2b2   : > { %1247 = vpow2.f32 %v792_v54  ;;  %v765_v58 = vsub.f32 %v1702_v3, %v749_v57  ;;  %808 = vadd.xlane.f32.xlu1 %v1736_v56 }
 0x2b3   : > { %v1740_v59 = vpop.eup %1237  ;;  %1249 = vpow2.f32 %v794_v55 }
 0x2b4   : > { %v796_v60 = vmul.f32 1.442695, %v765_v58  ;;  %818 = vadd.xlane.f32.xlu0 %v1740_v59 }
 0x2b5   : > { %v1743_v61 = vpop.eup %1239 }
 0x2b6   : > { %1251 = vpow2.f32 %v796_v60  ;;  %820 = vadd.xlane.f32.xlu1 %v1743_v61 }
 0x2b7   : > { %v1746_v62 = vpop.eup %1241 }
 0x2b8   : > { %814 = vadd.xlane.f32.xlu0 %v1746_v62 }
 0x2b9   : > { %v1749_v63 = vpop.eup %1243 }
 0x2ba   : > { %816 = vadd.xlane.f32.xlu1 %v1749_v63 }
 0x2bb   : > { %v1752_v0 = vpop.eup %1245 }
 0x2bc   : > { %822 = vadd.xlane.f32.xlu0 %v1752_v0 }
 0x2bf   : > { %v1755_v1 = vpop.eup %1247 }
 0x2c0   : > { %v1757_v2 = vpop.eup %1249  ;;  %824 = vadd.xlane.f32.xlu1 %v1755_v1 }
 0x2c1   : > { %826 = vadd.xlane.f32.xlu0 %v1757_v2 }
 0x2c3   : > { %v1761_v3 = vpop.eup %1251 }
 0x2c4   : > { %828 = vadd.xlane.f32.xlu1 %v1761_v3 }
 0x32b   : > { %v803_v4 = vpop.xlane.xlu0 %802 }
 0x32c   : > { %1253 = vrcp.f32 %v803_v4 }
 0x32f   : > { %v805_v5 = vpop.xlane.xlu1 %804  ;;  %v799_v6 = vpop.xlane.xlu0 %798 }
 0x330   : > { %1255 = vrcp.f32 %v805_v5 }
 0x331   : > { %1257 = vrcp.f32 %v799_v6 }
 0x333   : > { %v801_v7 = vpop.xlane.xlu1 %800 }
 0x334   : > { %1259 = vrcp.f32 %v801_v7 }
 0x335   : > { %v811_v8 = vpop.xlane.xlu0 %810 }
 0x336   : > { %1261 = vrcp.f32 %v811_v8 }
 0x337   : > { %v813_v9 = vpop.xlane.xlu1 %812 }
 0x338   : > { %1263 = vrcp.f32 %v813_v9 }
 0x339   : > { %v1254_v10 = vpop.eup %1253  ;;  %v807_v11 = vpop.xlane.xlu0 %806 }
 0x33a   : > { %v848_v12 = vmul.f32 %v1254_v10, %v1708_v27  ;;  %1265 = vrcp.f32 %v807_v11 }
 0x33b   : > { %v809_v13 = vpop.xlane.xlu1 %808 }
 0x33c   : > { %864 = vst [vmem:[%s1766_s13 + $0x10] sm:$0xff] %v848_v12  ;;  %1267 = vrcp.f32 %v809_v13 }
 0x33d   : > { %v1256_v14 = vpop.eup %1255  ;;  %v819_v15 = vpop.xlane.xlu0 %818 }
 0x33e   : > { %v1258_v16 = vpop.eup %1257  ;;  %v849_v17 = vmul.f32 %v1256_v14, %v1715_v35  ;;  %1269 = vrcp.f32 %v819_v15 }
 0x33f   : > { %v846_v18 = vmul.f32 %v1258_v16, %v1712_v32  ;;  %v821_v19 = vpop.xlane.xlu1 %820 }
 0x340   : > { %865 = vst [vmem:[%s1766_s13 + $0x18] sm:$0xff] %v849_v17  ;;  %1271 = vrcp.f32 %v821_v19 }
 0x341   : > { %v1260_v20 = vpop.eup %1259  ;;  %862 = vst [vmem:[%s1766_s13] sm:$0xff] %v846_v18  ;;  %v815_v21 = vpop.xlane.xlu0 %814 }
 0x342   : > { %v847_v22 = vmul.f32 %v1260_v20, %v1721_v42  ;;  %1273 = vrcp.f32 %v815_v21 }
 0x343   : > { %v1262_v23 = vpop.eup %1261  ;;  %v817_v24 = vpop.xlane.xlu1 %816 }
 0x344   : > { %863 = vst [vmem:[%s1766_s13 + $0x8] sm:$0xff] %v847_v22  ;;  %v852_v25 = vmul.f32 %v1262_v23, %v1725_v46  ;;  %1275 = vrcp.f32 %v817_v24 }
 0x345   : > { %v1264_v26 = vpop.eup %1263  ;;  %v823_v27 = vpop.xlane.xlu0 %822 }
 0x346   : > { %868 = vst [vmem:[%s1766_s13 + $0x30] sm:$0xff] %v852_v25  ;;  %v853_v28 = vmul.f32 %v1264_v26, %v1728_v48  ;;  %1277 = vrcp.f32 %v823_v27 }
 0x347   : > { %v1266_v29 = vpop.eup %1265 }
 0x348   : > { %869 = vst [vmem:[%s1766_s13 + $0x38] sm:$0xff] %v853_v28  ;;  %v850_v30 = vmul.f32 %v1266_v29, %v1733_v53 }
 0x349   : > { %v1268_v31 = vpop.eup %1267  ;;  %v825_v32 = vpop.xlane.xlu1 %824 }
 0x34a   : > { %866 = vst [vmem:[%s1766_s13 + $0x20] sm:$0xff] %v850_v30  ;;  %v851_v33 = vmul.f32 %v1268_v31, %v1736_v56  ;;  %1279 = vrcp.f32 %v825_v32  ;;  %v827_v34 = vpop.xlane.xlu0 %826 }
 0x34b   : > { %v1270_v35 = vpop.eup %1269  ;;  %1281 = vrcp.f32 %v827_v34 }
 0x34c   : > { %867 = vst [vmem:[%s1766_s13 + $0x28] sm:$0xff] %v851_v33  ;;  %v856_v36 = vmul.f32 %v1270_v35, %v1740_v59 }
 0x34d   : > { %v1272_v37 = vpop.eup %1271  ;;  %v829_v38 = vpop.xlane.xlu1 %828 }
 0x34e   : > { %872 = vst [vmem:[%s1766_s13 + $0x50] sm:$0xff] %v856_v36  ;;  %v857_v39 = vmul.f32 %v1272_v37, %v1743_v61  ;;  %1283 = vrcp.f32 %v829_v38 }
 0x34f   : > { %v1274_v40 = vpop.eup %1273 }
 0x350   : > { %873 = vst [vmem:[%s1766_s13 + $0x58] sm:$0xff] %v857_v39  ;;  %v854_v41 = vmul.f32 %v1274_v40, %v1746_v62 }
 0x351   : > { %v1276_v42 = vpop.eup %1275 }
 0x352   : > { %870 = vst [vmem:[%s1766_s13 + $0x40] sm:$0xff] %v854_v41  ;;  %v855_v43 = vmul.f32 %v1276_v42, %v1749_v63 }
 0x353   : > { %v1278_v44 = vpop.eup %1277 }
 0x354   : > { %871 = vst [vmem:[%s1766_s13 + $0x48] sm:$0xff] %v855_v43  ;;  %v858_v45 = vmul.f32 %v1278_v44, %v1752_v0 }
 0x356   : > { %874 = vst [vmem:[%s1766_s13 + $0x60] sm:$0xff] %v858_v45 }
 0x357   : > { %v1280_v46 = vpop.eup %1279 }
 0x358   : > { %v1282_v47 = vpop.eup %1281  ;;  %v859_v48 = vmul.f32 %v1280_v46, %v1755_v1 }
 0x359   : > { %v860_v49 = vmul.f32 %v1282_v47, %v1757_v2 }
 0x35a   : > { %875 = vst [vmem:[%s1766_s13 + $0x68] sm:$0xff] %v859_v48 }
 0x35b   : > { %v1284_v50 = vpop.eup %1283  ;;  %876 = vst [vmem:[%s1766_s13 + $0x70] sm:$0xff] %v860_v49 }
 0x35c   : > { %v861_v51 = vmul.f32 %v1284_v50, %v1761_v3 }
 0x35e   : > { %877 = vst [vmem:[%s1766_s13 + $0x78] sm:$0xff] %v861_v51 }
 0x35f   : > { %1378 = shalt.err (!%p1375_p3)
}
 0x360   : > { %s1379_s24 = scalar_lea.hbm %s1802_s17, 2048  ;;  %s1383_s10 = scalar_lea.hbm %s1854_s5, 4096 }
 0x361   : > { %p1380_p11 = scmp.ne.s32.totalorder %s1802_s17, %s1379_s24  ;;  %p1384_p4 = scmp.lt.s32.totalorder %s1802_s17, %s1854_s5 }
 0x362   : > { %p1385_p6 = scmp.lt.s32.totalorder %s1383_s10, %s1379_s24 }
 0x363   : > { %p1381_p9 = pnand %p1380_p11, %p1871_p2 }
 0x364   : > { %p1386_p8 = por %p1385_p6, %p1384_p4 }
 0x365   : > { %p1382_p1 = pneg %p1381_p9 }
 0x367   : > { %p1387_p5 = pnand %p1386_p8, %p1382_p1 }
 0x369   : > { %1390 = shalt.err (!%p1387_p5)
}
 0x36a   : > { %s1441_s14 = smov 128   ;;  %s1442_s28 = smov 8  }
 0x36b   : > { %1136 = dma.vmem_to_hbm [thread:$0]  (%p1871_p2), %s1804_s7, 2048, %s1802_s17, %s879_s22, %s1441_s14, %s1441_s14, %s1442_s28  }
 0x36c PF: > { %s907_s11 = sand.u32 1, %s1421_s18   ;;  %p1872_p7 = scmp.ne.s32.totalorder %s1861_s25, 0 }
 0x36d   : > { %p1873_p12 = scmp.ge.s32.totalorder %s1433_s21, 2  ;;  %s908_s16 = scalar_lea.sflag [#allocation4], %s907_s11 }
 0x36f   : > { %p1150_p13 = pnand %p1873_p12, %p1872_p7 }
 0x371   : > { %p1151_p0 = pneg %p1150_p13 }
 0x373   : > { %1416 = dma.done.wait (%p1151_p0), %s908_s16, 2048  }
 0x374   : > { %1418 = vsyncadd (%p1151_p0), %s908_s16, 4294965248  ;;  %p19_p10 = scmp.ge.s32.totalorder %s1551_s15, 4   ;;  %s1874_s18 = smov %s1425_s19 }
 0x375   : > { %s1875_s19 = smov %s1429_s20  ;;  %s1876_s20 = smov %s1567_s27 }
 0x376   : > { %s1877_s21 = smov %s1551_s15  ;;  %21 = sbr.rel (!%p19_p10) target bundleno = 6 (0x6), region = 93 }
 0x37b   :  { %913 = vsyncpa [#allocation3], 1 }
 0x37c   :  { %915 = vsyncpa [#allocation3 + $0x1], 1 }
 0x37d   :  { %916 = vsyncpa [#allocation6], 1 }
 0x37e   :  { %917 = vsyncpa [#allocation4], 1 }
 0x37f   :  { %919 = vsyncpa [#allocation4 + $0x1], 1 }

</bundles_post_ra>
